<compile_context>
chip_gen: v6e
topology: v6e:2x2x1
jax: 0.10.0
libtpu: 0.0.40
codegen_flags: <defaults>
</compile_context>

<pallas_src>
from functools import partial

import jax
import jax.numpy as jnp
import numpy as np
from jax.experimental import pallas as pl
from jax.experimental.pallas import tpu as pltpu

_LANES = 128
_SUBLANES = 8


# ----------------------------------------------------------------------------
# Interpolation step kernel (non-gradient path)
# ----------------------------------------------------------------------------

def _pick_interp_rows():
    """Rows per interp tile: 3 arrays x 2 pipeline buffers, total <= ~24 MiB.

    Sized against the physical VMEM of the chip we run on so the same code is
    correct for v5e/v6e (128 MiB) and v7x (64 MiB).
    """
    try:
        vmem = int(pltpu.get_tpu_info().vmem_capacity_bytes)
    except Exception:
        vmem = 64 << 20                      # conservative (v7x per-TensorCore)
    budget = min(24 << 20, vmem // 3)
    rows = budget // (6 * _LANES * 4)        # 6 resident (rows, 128) f32 blocks
    rows = max(_SUBLANES, min(8192, (rows // _SUBLANES) * _SUBLANES))
    return int(rows)


_MAX_INTERP_ROWS = _pick_interp_rows()


def _interp_kernel(src_ref, tgt_ref, out_ref, *, split):
    s = src_ref[...]
    # Exact divide (matches PyTorch's `/ split_size`); the kernel is
    # HBM-bandwidth bound so the divide is hidden.
    out_ref[...] = s + (tgt_ref[...] - s) / split


@partial(jax.jit, static_argnums=(2,), donate_argnums=(0,))
def interp_step_flat(src_flat, tgt_flat, split_size):
    """One non-gradient PathFinder step on the persistent flat (R,128) buffer."""
    R, C = src_flat.shape
    tile_r = min(R, _MAX_INTERP_ROWS)       # R is padded so tile_r divides it
    grid = (R // tile_r,)
    block_bytes = tile_r * C * 4
    cost = pl.CostEstimate(flops=3 * R * C, transcendentals=0,
                           bytes_accessed=3 * R * C * 4)
    # TODO(synk): on v7x, shard this grid axis across the 2 TensorCores with
    # pltpu.CORE_PARALLEL once the core count can be queried portably.
    return pl.pallas_call(
        partial(_interp_kernel, split=float(split_size)),
        out_shape=jax.ShapeDtypeStruct((R, C), src_flat.dtype),
        grid=grid,
        in_specs=[
            pl.BlockSpec((tile_r, C), lambda i: (i, 0)),
            pl.BlockSpec((tile_r, C), lambda i: (i, 0)),
        ],
        out_specs=pl.BlockSpec((tile_r, C), lambda i: (i, 0)),
        input_output_aliases={0: 0},        # in-place update of the src buffer
        cost_estimate=cost,
        compiler_params=pltpu.CompilerParams(
            dimension_semantics=("parallel",),
            vmem_limit_bytes=int(max(8 << 20, 6 * block_bytes + (4 << 20)))),
    )(src_flat, tgt_flat)


# ----------------------------------------------------------------------------
# Fused synthetic model (conv-as-matmul + ReLU + linear) -- gradient path
# ----------------------------------------------------------------------------

_K_PAD = 128       # padded im2col contraction depth (9*C = 36 -> 128)
_NCLS_PAD = 128    # padded class dim so the FC output store is lane-dense


def _fused_model_kernel(a_ref, wconv_ref, bconv_ref, wfc_ref, bfc_ref,
                        out_ref, act_ref, *, n_batch, o_ch, hw):
    # One grid step handles the whole batch:
    #   a_ref:     (K_PAD, N*HW)     bf16  im2col, samples stacked along lanes
    #   wconv_ref: (O, K_PAD)        bf16  conv weights (im2col layout)
    #   bconv_ref: (O, 1)            f32   conv bias
    #   wfc_ref:   (O, HW, NCLS_PAD) bf16  FC weights regrouped per conv channel
    #   bfc_ref:   (1, NCLS_PAD)     f32   FC bias (padded)
    #   out_ref:   (N, NCLS_PAD)     f32   logits (padded), full rows
    #   act_ref:   (N*O, HW)         f32   scratch, row index = n*O + o
    # Single conv matmul over the whole batch (bf16 operands, f32 accumulate).
    conv_t = jnp.dot(wconv_ref[...], a_ref[...],
                     preferred_element_type=jnp.float32)           # (O, N*HW)
    conv_t = jnp.maximum(conv_t + bconv_ref[...], 0.0)             # bias + ReLU

    # Re-group sample-major-in-lanes -> sample-in-sublanes through VMEM so the
    # FC matmuls get M = N rows instead of M = 1.  Stores are contiguous,
    # 8-row-aligned tiles; the per-channel reads are strided sublane loads.
    for n in range(n_batch):                                       # N, unrolled
        act_ref[pl.ds(n * o_ch, o_ch), :] = conv_t[:, n * hw:(n + 1) * hw]

    acc = jnp.zeros(out_ref.shape, jnp.float32)
    for o in range(o_ch):                                          # O=8, unrolled
        x_o = act_ref[pl.ds(o, n_batch, stride=o_ch), :]           # (N, HW)
        acc = acc + jnp.dot(x_o.astype(jnp.bfloat16), wfc_ref[o],
                            preferred_element_type=jnp.float32)    # (N, NCLS_PAD)
    out_ref[...] = (acc + bfc_ref[...]).astype(out_ref.dtype)


@jax.jit
def pack_model_weights(params):
    """Repack conv/fc weights into the kernel's bf16 layouts (cached by caller)."""
    O, C = params["conv_w"].shape[:2]
    NCLS, F = params["fc_w"].shape
    K = 9 * C
    HW = F // O
    # conv OIHW -> (O, K) in (dy, dx, c) patch order, pad K -> 128, bf16.
    wc = jnp.transpose(params["conv_w"], (2, 3, 1, 0)).reshape(K, O)
    w_conv = jnp.pad(wc.T, ((0, 0), (0, _K_PAD - K))).astype(jnp.bfloat16)
    b_conv = params["conv_b"].reshape(O, 1).astype(jnp.float32)
    # FC weight regrouped so logits = sum_o act_o @ wfc[o]:
    #   wfc[o, p, c] = fc_w[c, p*O + o]   (NHWC flatten order, p = h*W + w)
    wfc = jnp.transpose(params["fc_w"].reshape(NCLS, HW, O), (2, 1, 0))
    wfc = jnp.pad(wfc, ((0, 0), (0, 0), (0, _NCLS_PAD - NCLS))).astype(jnp.bfloat16)
    b_fc = jnp.pad(params["fc_b"], (0, _NCLS_PAD - NCLS)).reshape(1, _NCLS_PAD)
    return {"w_conv": w_conv, "b_conv": b_conv,
            "w_fc": wfc, "b_fc": b_fc.astype(jnp.float32)}


@partial(jax.jit, static_argnums=(2,))
def model_forward(packed, x_nchw, n_cls):
    """Conv2d(3x3, pad=1) + ReLU -> flatten (NHWC) -> Linear, fused in one kernel."""
    N, C, H, W = x_nchw.shape
    HW = H * W
    K = 9 * C
    O = packed["w_conv"].shape[0]

    # TODO(synk): im2col is still built in plain JAX; moving the halo gather
    # into the kernel removes the activation HBM inflation but needs in-kernel
    # cross-lane relayouts that only pay off at real image sizes.
    x = jnp.transpose(x_nchw, (0, 2, 3, 1))                        # NCHW -> NHWC
    xp = jnp.pad(x, ((0, 0), (1, 1), (1, 1), (0, 0)))
    patches = jnp.concatenate(
        [xp[:, dy:dy + H, dx:dx + W, :] for dy in range(3) for dx in range(3)],
        axis=-1)                                                   # (N, H, W, 9C)
    a2 = jnp.transpose(patches.reshape(N, HW, K), (2, 0, 1)).reshape(K, N * HW)
    a2 = jnp.pad(a2, ((0, _K_PAD - K), (0, 0))).astype(jnp.bfloat16)  # (K_PAD, N*HW)

    flops = 2 * O * _K_PAD * N * HW + 2 * O * N * HW * _NCLS_PAD
    bytes_accessed = int(a2.size * 2 + packed["w_conv"].size * 2 +
                         packed["w_fc"].size * 2 + packed["b_conv"].size * 4 +
                         packed["b_fc"].size * 4 + N * _NCLS_PAD * 4)

    # grid=(1,): weights are fetched once, so no double-buffering of the
    # constant operands is needed.
    out = pl.pallas_call(
        partial(_fused_model_kernel, n_batch=N, o_ch=O, hw=HW),
        out_shape=jax.ShapeDtypeStruct((N, _NCLS_PAD), jnp.float32),
        grid=(1,),
        in_specs=[
            pl.BlockSpec((_K_PAD, N * HW), lambda i: (0, 0)),
            pl.BlockSpec((O, _K_PAD), lambda i: (0, 0)),
            pl.BlockSpec((O, 1), lambda i: (0, 0)),
            pl.BlockSpec((O, HW, _NCLS_PAD), lambda i: (0, 0, 0)),
            pl.BlockSpec((1, _NCLS_PAD), lambda i: (0, 0)),
        ],
        out_specs=pl.BlockSpec((N, _NCLS_PAD), lambda i: (0, 0)),
        scratch_shapes=[pltpu.VMEM((N * O, HW), jnp.float32)],
        cost_estimate=pl.CostEstimate(flops=flops, transcendentals=0,
                                      bytes_accessed=bytes_accessed),
        compiler_params=pltpu.CompilerParams(
            dimension_semantics=("arbitrary",)),
    )(a2, packed["w_conv"], packed["b_conv"], packed["w_fc"], packed["b_fc"])
    return out[:, :n_cls]


# ----------------------------------------------------------------------------
# Synthetic wrapped model parameters
# ----------------------------------------------------------------------------

def make_params(key, c_in=4, c_out=8, hw=16, n_cls=10):
    k1, k2, k3, k4 = jax.random.split(key, 4)
    return {
        "conv_w": 0.1 * jax.random.normal(k1, (c_out, c_in, 3, 3), jnp.float32),  # OIHW
        "conv_b": 0.1 * jax.random.normal(k2, (c_out,), jnp.float32),
        "fc_w": 0.05 * jax.random.normal(k3, (n_cls, c_out * hw * hw), jnp.float32),
        "fc_b": 0.05 * jax.random.normal(k4, (n_cls,), jnp.float32),
    }


# ----------------------------------------------------------------------------
# PathFinder (functional JAX analog of the PyTorch module)
# ----------------------------------------------------------------------------

class PathFinderPallas:
    def __init__(self, src_params, tgt_params, step_min=0.001, del_loss=0.004,
                 split_size=10, window=5):
        src_leaves, treedef = jax.tree_util.tree_flatten(src_params)
        tgt_leaves, tgt_treedef = jax.tree_util.tree_flatten(tgt_params)
        assert treedef == tgt_treedef
        assert all(s.shape == t.shape for s, t in zip(src_leaves, tgt_leaves))
        self.step_min = step_min
        self.del_loss = del_loss
        self.split_size = split_size
        self.window = window
        self._treedef = treedef
        self._shapes = [l.shape for l in src_leaves]
        self._sizes = [int(l.size) for l in src_leaves]
        self._total = sum(self._sizes)
        # Persistent flat (R, 128) f32 buffers: flatten ONCE, interpolate in place.
        self._src_flat = self._flatten(src_leaves)
        self._tgt_flat = self._flatten(tgt_leaves)
        self._src_cache = src_params        # unflattened view, invalidated on interp
        self._packed = None                 # cached bf16 kernel-layout weights
        self._n_cls = int(src_params["fc_b"].shape[0])
        # TODO(synk): display_results / logging and the _modules/_parameters
        # registry merging are host-side bookkeeping with no Pallas equivalent.

    def _flatten(self, leaves):
        flat = jnp.concatenate([jnp.ravel(l).astype(jnp.float32) for l in leaves])
        pad = (-flat.shape[0]) % (_SUBLANES * _LANES)          # rows multiple of 8
        flat = jnp.pad(flat, (0, pad))
        rows = flat.shape[0] // _LANES
        if rows > _MAX_INTERP_ROWS:                            # keep grid tiles even
            extra = ((-rows) % _MAX_INTERP_ROWS) * _LANES
            if extra:
                flat = jnp.pad(flat, (0, extra))
        return flat.reshape(-1, _LANES)

    def _unflatten(self, flat2d):
        flat = flat2d.reshape(-1)[: self._total]
        out, idx = [], 0
        for shp, n in zip(self._shapes, self._sizes):
            out.append(flat[idx: idx + n].reshape(shp))
            idx += n
        return jax.tree_util.tree_unflatten(self._treedef, out)

    @property
    def src_params(self):
        if self._src_cache is None:
            self._src_cache = self._unflatten(self._src_flat)
        return self._src_cache

    def _packed_weights(self):
        if self._packed is None:
            self._packed = pack_model_weights(self.src_params)
        return self._packed

    def forward(self, x=None, gradient=False):
        if not gradient:
            # non-gradient step: p_src += (p_tgt - p_src) / split_size
            self._src_flat = interp_step_flat(self._src_flat, self._tgt_flat,
                                              self.split_size)
            self._src_cache = None
            self._packed = None             # weights changed -> repack lazily
            return None
        return model_forward(self._packed_weights(), x, self._n_cls)


# ----------------------------------------------------------------------------
# Main
# ----------------------------------------------------------------------------

if __name__ == "__main__":
    key = jax.random.PRNGKey(0)
    k_src, k_tgt, k_x = jax.random.split(key, 3)

    N, C, H, W, O, NCLS = 2, 4, 16, 16, 8, 10
    src_params = make_params(k_src, c_in=C, c_out=O, hw=H, n_cls=NCLS)
    tgt_params = make_params(k_tgt, c_in=C, c_out=O, hw=H, n_cls=NCLS)
    x = jax.random.normal(k_x, (N, C, H, W), jnp.float32)        # NCHW, like PyTorch

    pf = PathFinderPallas(src_params, tgt_params, split_size=10)

    # --- non-gradient step (in-place interpolation kernel) ---
    src_before = {k: v for k, v in src_params.items()}
    pf.forward(gradient=False)
    new_src = pf.src_params
    jax.block_until_ready(jax.tree_util.tree_leaves(new_src))
    for name in src_before:
        ref = src_before[name] + (tgt_params[name] - src_before[name]) / 10.0
        np.testing.assert_allclose(np.asarray(new_src[name]), np.asarray(ref),
                                   rtol=1e-5, atol=1e-5)

    # --- gradient path (fused conv-as-matmul + linear kernel, bf16 operands) ---
    logits = pf.forward(x, gradient=True)
    logits = jax.block_until_ready(logits)

    # pure-JAX reference for the synthetic wrapped model (on post-step params),
    # with the same bf16 operand rounding / f32 accumulation as the kernel.
    p = new_src
    xb = x.astype(jnp.bfloat16)
    wcb = p["conv_w"].astype(jnp.bfloat16)
    conv_ref = jax.lax.conv_general_dilated(
        xb, wcb, window_strides=(1, 1), padding="SAME",
        dimension_numbers=("NCHW", "OIHW", "NCHW"),
        preferred_element_type=jnp.float32)
    conv_ref = jnp.maximum(conv_ref + p["conv_b"][None, :, None, None], 0.0)
    feat_ref = jnp.transpose(conv_ref, (0, 2, 3, 1)).reshape(N, H * W * O)  # NHWC
    logits_ref = jnp.dot(feat_ref.astype(jnp.bfloat16),
                         p["fc_w"].astype(jnp.bfloat16).T,
                         preferred_element_type=jnp.float32) + p["fc_b"]

    np.testing.assert_allclose(np.asarray(logits), np.asarray(logits_ref),
                               rtol=2e-3, atol=2e-3)
    assert logits.shape == (N, NCLS)

    print("KERNEL_OK")
</pallas_src>

<mosaic_0001>
module attributes {stable_mosaic.version = 11 : i64} {
  func.func @_interp_kernel(%arg0: i32, %arg1: memref<168x128xf32, #tpu.memory_space<vmem>>, %arg2: memref<168x128xf32, #tpu.memory_space<vmem>>, %arg3: memref<168x128xf32, #tpu.memory_space<vmem>>) attributes {dimension_semantics = [#tpu.dimension_semantics<parallel>], iteration_bounds = array<i64: 1>, scalar_prefetch = 0 : i64, scratch_operands = 0 : i64, tpu.core_type = #tpu.core_type<tc>, window_params = [{transform_indices = @transform_0, window_bounds = array<i64: 168, 128>}, {transform_indices = @transform_1, window_bounds = array<i64: 168, 128>}, {transform_indices = @transform_2, window_bounds = array<i64: 168, 128>}]} {
    %c0 = arith.constant 0 : index
    %c0_0 = arith.constant 0 : index
    %0 = vector.load %arg1[%c0, %c0_0] : memref<168x128xf32, #tpu.memory_space<vmem>>, vector<168x128xf32>
    %c0_1 = arith.constant 0 : index
    %c0_2 = arith.constant 0 : index
    %1 = vector.load %arg2[%c0_1, %c0_2] : memref<168x128xf32, #tpu.memory_space<vmem>>, vector<168x128xf32>
    %2 = arith.subf %1, %0 : vector<168x128xf32>
    %cst = arith.constant 1.000000e+01 : f32
    %3 = vector.broadcast %cst : f32 to vector<168x128xf32>
    %4 = arith.divf %2, %3 : vector<168x128xf32>
    %5 = arith.addf %0, %4 : vector<168x128xf32>
    %c0_3 = arith.constant 0 : index
    %c0_4 = arith.constant 0 : index
    %6 = vector.load %arg3[%c0_3, %c0_4] : memref<168x128xf32, #tpu.memory_space<vmem>>, vector<168x128xf32>
    tpu.vector_store %arg3[%c0_3, %c0_4], %5 {strides = array<i32>} : memref<168x128xf32, #tpu.memory_space<vmem>>, vector<168x128xf32>,
    return
  }
  func.func @transform_0(%arg0: i32) -> (i32, i32) {
    %c0_i32 = arith.constant 0 : i32
    %c0_i32_0 = arith.constant 0 : i32
    return %arg0, %c0_i32 : i32, i32
  }
  func.func @transform_1(%arg0: i32) -> (i32, i32) {
    %c0_i32 = arith.constant 0 : i32
    %c0_i32_0 = arith.constant 0 : i32
    return %arg0, %c0_i32 : i32, i32
  }
  func.func @transform_2(%arg0: i32) -> (i32, i32) {
    %c0_i32 = arith.constant 0 : i32
    %c0_i32_0 = arith.constant 0 : i32
    return %arg0, %c0_i32 : i32, i32
  }
}

</mosaic_0001>

<bundles_post_ra>
// kernel: interp_step_flat.1
= control target key start
LH: loop header
LB: loop body
LE: loop exit
PB: predicated region body
PF: predicated region fallthrough
CT: control target
= control target key end

     0   :  { %7 = vsyncpa [#allocation3], 0  ;;  %s294_s0 = inlined_call_operand.hbm [shape: f32[168,128], index: 0, kind: input, shape index: {}, may-alias: {0,2}]   ;;  %s295_s1 = inlined_call_operand.hbm [shape: f32[168,128], index: 1, kind: input, shape index: {}]   ;;  %s296_s2 = inlined_call_operand.hbm [shape: f32[168,128], index: 2, kind: output, shape index: {}, may-alias: {0,2}]  }
   0x1   :  { %8 = vsyncpa [#allocation6], 0 }
   0x2   :  { %9 = vsyncpa [#allocation4], 0  ;;  %s256_s9 = smov [#allocation2]  }
   0x3   :  { %s15_s10 = sshll.u32 %s256_s9, 4  ;;  %s16_s10 = int_to_ptr.vmem [resolvable:$true] %s15_s10 }
   0x4   :  { %s198_s11 = scalar_lea.vmem %s16_s10, 2688  ;;  %p203_p1 = scmp.lt.s32.totalorder %s16_s10, %s16_s10 }
   0x5   :  { %p199_p0 = scmp.ne.s32.totalorder %s16_s10, %s198_s11  ;;  %p204_p2 = scmp.lt.s32.totalorder %s198_s11, %s198_s11 }
   0x7   :  { %p205_p3 = por %p204_p2, %p203_p1 }
   0x9   :  { %p206_p4 = pnand %p205_p3, %p199_p0 }
   0xb   :  { %209 = shalt.err (!%p206_p4)
}
   0xc   :  { %s257_s12 = smov 128   ;;  %s258_s13 = smov 8  }
   0xd   :  { %21 = dma.hbm_to_vmem [thread:$0]  %s294_s0, 2688, %s16_s10, [#allocation3], %s257_s12, %s257_s12, %s258_s13  }
   0xe   :  { %s259_s16 = smov [#allocation5]  }
   0xf   :  { %s27_s17 = sshll.u32 %s259_s16, 4  ;;  %s28_s17 = int_to_ptr.vmem [resolvable:$true] %s27_s17 }
  0x10   :  { %s218_s18 = scalar_lea.vmem %s28_s17, 2688  ;;  %p223_p6 = scmp.lt.s32.totalorder %s28_s17, %s28_s17 }
  0x11   :  { %p219_p5 = scmp.ne.s32.totalorder %s28_s17, %s218_s18  ;;  %p224_p7 = scmp.lt.s32.totalorder %s218_s18, %s218_s18 }
  0x13   :  { %p225_p8 = por %p224_p7, %p223_p6 }
  0x15   :  { %p226_p9 = pnand %p225_p8, %p219_p5 }
  0x17   :  { %229 = shalt.err (!%p226_p9)
}
  0x18   :  { %33 = dma.hbm_to_vmem [thread:$0]  %s295_s1, 2688, %s28_s17, [#allocation6], %s257_s12, %s257_s12, %s258_s13  }
  0x19   :  { %250 = dma.done.wait [#allocation3], 2688  }
  0x1a   :  { %251 = vsyncadd [#allocation3], 4294964608 }
  0x1b   :  { %252 = dma.done.wait [#allocation6], 2688  }
  0x1c   :  { %253 = vsyncadd [#allocation6], 4294964608  ;;  %v40_v0 = vld [vmem:[#allocation2] sm:$0xff]  ;;  %v61_v1 = vld [vmem:[#allocation5] sm:$0xff]  ;;  %s260_s0 = smov [#allocation7]  }
  0x1d   :  { %v41_v2 = vld [vmem:[#allocation2 + $0x8] sm:$0xff]  ;;  %v82_v3 = vsub.f32 %v61_v1, %v40_v0  ;;  %v62_v4 = vld [vmem:[#allocation5 + $0x8] sm:$0xff]  ;;  %v63_v6 = vld [vmem:[#allocation5 + $0x10] sm:$0xff]  ;;  %s172_s1 = sshll.u32 %s260_s0, 4  ;;  %s173_s1 = int_to_ptr.vmem [resolvable:$true] %s172_s1 }
  0x1e   :  { %v42_v5 = vld [vmem:[#allocation2 + $0x10] sm:$0xff]  ;;  %v83_v7 = vsub.f32 %v62_v4, %v41_v2  ;;  %v43_v9 = vld [vmem:[#allocation2 + $0x18] sm:$0xff]  ;;  %v64_v10 = vld [vmem:[#allocation5 + $0x18] sm:$0xff]  ;;  %s230_s21 = scalar_lea.vmem %s173_s1, 2688  ;;  %p235_p11 = scmp.lt.s32.totalorder %s173_s1, %s173_s1 }
  0x1f   :  { %v84_v8 = vsub.f32 %v63_v6, %v42_v5  ;;  %v44_v11 = vld [vmem:[#allocation2 + $0x20] sm:$0xff]  ;;  %v104_v12 = vmul.f32 0.1, %v82_v3  ;;  %v85_v13 = vsub.f32 %v64_v10, %v43_v9  ;;  %v65_v14 = vld [vmem:[#allocation5 + $0x20] sm:$0xff]  ;;  %v66_v16 = vld [vmem:[#allocation5 + $0x28] sm:$0xff]  ;;  %p231_p10 = scmp.ne.s32.totalorder %s173_s1, %s230_s21  ;;  %p236_p12 = scmp.lt.s32.totalorder %s230_s21, %s230_s21 }
  0x20   :  { %v45_v15 = vld [vmem:[#allocation2 + $0x28] sm:$0xff]  ;;  %v105_v17 = vmul.f32 0.1, %v83_v7  ;;  %v86_v19 = vsub.f32 %v65_v14, %v44_v11  ;;  %v46_v21 = vld [vmem:[#allocation2 + $0x30] sm:$0xff]  ;;  %v67_v22 = vld [vmem:[#allocation5 + $0x30] sm:$0xff] }
  0x21   :  { %v106_v18 = vmul.f32 0.1, %v84_v8  ;;  %v87_v20 = vsub.f32 %v66_v16, %v45_v15  ;;  %v125_v23 = vadd.f32 %v104_v12, %v40_v0  ;;  %v107_v24 = vmul.f32 0.1, %v85_v13  ;;  %v47_v26 = vld [vmem:[#allocation2 + $0x38] sm:$0xff]  ;;  %v68_v27 = vld [vmem:[#allocation5 + $0x38] sm:$0xff]  ;;  %p237_p13 = por %p236_p12, %p235_p11 }
  0x22   :  { %v88_v25 = vsub.f32 %v67_v22, %v46_v21  ;;  %v48_v28 = vld [vmem:[#allocation2 + $0x40] sm:$0xff]  ;;  %v126_v29 = vadd.f32 %v105_v17, %v41_v2  ;;  %v108_v31 = vmul.f32 0.1, %v86_v19  ;;  %v69_v33 = vld [vmem:[#allocation5 + $0x40] sm:$0xff]  ;;  %v89_v37 = vsub.f32 %v68_v27, %v47_v26  ;;  %v70_v39 = vld [vmem:[#allocation5 + $0x48] sm:$0xff] }
  0x23   :  { %v127_v30 = vadd.f32 %v106_v18, %v42_v5  ;;  %v109_v32 = vmul.f32 0.1, %v87_v20  ;;  %v49_v34 = vld [vmem:[#allocation2 + $0x48] sm:$0xff]  ;;  %146 = vst [vmem:[#allocation7] sm:$0xff] %v125_v23  ;;  %v128_v35 = vadd.f32 %v107_v24, %v43_v9  ;;  %v90_v38 = vsub.f32 %v69_v33, %v48_v28  ;;  %v50_v40 = vld [vmem:[#allocation2 + $0x50] sm:$0xff]  ;;  %v71_v41 = vld [vmem:[#allocation5 + $0x50] sm:$0xff]  ;;  %p238_p0 = pnand %p237_p13, %p231_p10 }
  0x24   :  { %v110_v36 = vmul.f32 0.1, %v88_v25  ;;  %147 = vst [vmem:[#allocation7 + $0x8] sm:$0xff] %v126_v29  ;;  %v129_v42 = vadd.f32 %v108_v31, %v44_v11  ;;  %v91_v44 = vsub.f32 %v70_v39, %v49_v34  ;;  %v92_v45 = vsub.f32 %v71_v41, %v50_v40  ;;  %v51_v46 = vld [vmem:[#allocation2 + $0x58] sm:$0xff]  ;;  %v72_v47 = vld [vmem:[#allocation5 + $0x58] sm:$0xff]  ;;  %v73_v53 = vld [vmem:[#allocation5 + $0x60] sm:$0xff] }
  0x25   :  { %148 = vst [vmem:[#allocation7 + $0x10] sm:$0xff] %v127_v30  ;;  %v130_v43 = vadd.f32 %v109_v32, %v45_v15  ;;  %v52_v48 = vld [vmem:[#allocation2 + $0x60] sm:$0xff]  ;;  %149 = vst [vmem:[#allocation7 + $0x18] sm:$0xff] %v128_v35  ;;  %v111_v50 = vmul.f32 0.1, %v89_v37  ;;  %v93_v52 = vsub.f32 %v72_v47, %v51_v46  ;;  %v53_v54 = vld [vmem:[#allocation2 + $0x68] sm:$0xff] }
  0x26   :  { %v131_v49 = vadd.f32 %v110_v36, %v46_v21  ;;  %v112_v51 = vmul.f32 0.1, %v90_v38  ;;  %150 = vst [vmem:[#allocation7 + $0x20] sm:$0xff] %v129_v42  ;;  %v113_v55 = vmul.f32 0.1, %v91_v44  ;;  %v94_v57 = vsub.f32 %v73_v53, %v52_v48  ;;  %v74_v58 = vld [vmem:[#allocation5 + $0x68] sm:$0xff] }
  0x27   :  { %151 = vst [vmem:[#allocation7 + $0x28] sm:$0xff] %v130_v43  ;;  %v114_v56 = vmul.f32 0.1, %v92_v45  ;;  %v54_v59 = vld [vmem:[#allocation2 + $0x70] sm:$0xff]  ;;  %v132_v60 = vadd.f32 %v111_v50, %v47_v26  ;;  %v115_v62 = vmul.f32 0.1, %v93_v52  ;;  %v95_v63 = vsub.f32 %v74_v58, %v53_v54 }
  0x28   :  { %152 = vst [vmem:[#allocation7 + $0x30] sm:$0xff] %v131_v49  ;;  %v133_v61 = vadd.f32 %v112_v51, %v48_v28  ;;  %v75_v0 = vld [vmem:[#allocation5 + $0x70] sm:$0xff]  ;;  %v76_v2 = vld [vmem:[#allocation5 + $0x78] sm:$0xff]  ;;  %v134_v3 = vadd.f32 %v113_v55, %v49_v34  ;;  %v116_v5 = vmul.f32 0.1, %v94_v57  ;;  %v77_v8 = vld [vmem:[#allocation5 + $0x80] sm:$0xff] }
  0x29   :  { %v55_v1 = vld [vmem:[#allocation2 + $0x78] sm:$0xff]  ;;  %v135_v4 = vadd.f32 %v114_v56, %v50_v40  ;;  %v96_v6 = vsub.f32 %v75_v0, %v54_v59  ;;  %v56_v7 = vld [vmem:[#allocation2 + $0x80] sm:$0xff]  ;;  %v57_v9 = vld [vmem:[#allocation2 + $0x88] sm:$0xff]  ;;  %153 = vst [vmem:[#allocation7 + $0x38] sm:$0xff] %v132_v60  ;;  %v136_v10 = vadd.f32 %v115_v62, %v51_v46  ;;  %v117_v11 = vmul.f32 0.1, %v95_v63 }
  0x2a   :  { %154 = vst [vmem:[#allocation7 + $0x40] sm:$0xff] %v133_v61  ;;  %v97_v12 = vsub.f32 %v76_v2, %v55_v1  ;;  %v98_v13 = vsub.f32 %v77_v8, %v56_v7  ;;  %v78_v14 = vld [vmem:[#allocation5 + $0x88] sm:$0xff]  ;;  %v79_v16 = vld [vmem:[#allocation5 + $0x90] sm:$0xff]  ;;  %155 = vst [vmem:[#allocation7 + $0x48] sm:$0xff] %v134_v3  ;;  %v137_v17 = vadd.f32 %v116_v5, %v52_v48 }
  0x2b   :  { %v58_v15 = vld [vmem:[#allocation2 + $0x90] sm:$0xff]  ;;  %156 = vst [vmem:[#allocation7 + $0x50] sm:$0xff] %v135_v4  ;;  %v118_v18 = vmul.f32 0.1, %v96_v6  ;;  %v99_v19 = vsub.f32 %v78_v14, %v57_v9  ;;  %v59_v21 = vld [vmem:[#allocation2 + $0x98] sm:$0xff]  ;;  %v80_v22 = vld [vmem:[#allocation5 + $0x98] sm:$0xff]  ;;  %v138_v24 = vadd.f32 %v117_v11, %v53_v54 }
  0x2c   :  { %v100_v20 = vsub.f32 %v79_v16, %v58_v15  ;;  %v60_v23 = vld [vmem:[#allocation2 + $0xa0] sm:$0xff]  ;;  %157 = vst [vmem:[#allocation7 + $0x58] sm:$0xff] %v136_v10  ;;  %v119_v25 = vmul.f32 0.1, %v97_v12  ;;  %v120_v26 = vmul.f32 0.1, %v98_v13  ;;  %v101_v27 = vsub.f32 %v80_v22, %v59_v21 }
  0x2d   :  { %v81_v28 = vld [vmem:[#allocation5 + $0xa0] sm:$0xff]  ;;  %158 = vst [vmem:[#allocation7 + $0x60] sm:$0xff] %v137_v17  ;;  %v139_v29 = vadd.f32 %v118_v18, %v54_v59  ;;  %v121_v30 = vmul.f32 0.1, %v99_v19  ;;  %159 = vst [vmem:[#allocation7 + $0x68] sm:$0xff] %v138_v24 }
  0x2e   :  { %v122_v31 = vmul.f32 0.1, %v100_v20  ;;  %v102_v32 = vsub.f32 %v81_v28, %v60_v23  ;;  %v140_v33 = vadd.f32 %v119_v25, %v55_v1  ;;  %v141_v34 = vadd.f32 %v120_v26, %v56_v7 }
  0x2f   :  { %v123_v35 = vmul.f32 0.1, %v101_v27  ;;  %160 = vst [vmem:[#allocation7 + $0x70] sm:$0xff] %v139_v29  ;;  %v142_v36 = vadd.f32 %v121_v30, %v57_v9 }
  0x30   :  { %v143_v37 = vadd.f32 %v122_v31, %v58_v15  ;;  %v124_v38 = vmul.f32 0.1, %v102_v32  ;;  %161 = vst [vmem:[#allocation7 + $0x78] sm:$0xff] %v140_v33  ;;  %162 = vst [vmem:[#allocation7 + $0x80] sm:$0xff] %v141_v34 }
  0x31   :  { %v144_v39 = vadd.f32 %v123_v35, %v59_v21  ;;  %163 = vst [vmem:[#allocation7 + $0x88] sm:$0xff] %v142_v36 }
  0x32   :  { %164 = vst [vmem:[#allocation7 + $0x90] sm:$0xff] %v143_v37  ;;  %v145_v40 = vadd.f32 %v124_v38, %v60_v23 }
  0x33   :  { %165 = vst [vmem:[#allocation7 + $0x98] sm:$0xff] %v144_v39 }
  0x34   :  { %166 = vst [vmem:[#allocation7 + $0xa0] sm:$0xff] %v145_v40 }
  0x35   :  { %241 = shalt.err (!%p238_p0)
}
  0x36   :  { %178 = dma.vmem_to_hbm [thread:$0]  %s173_s1, 2688, %s296_s2, [#allocation4], %s257_s12, %s257_s12, %s258_s13  }
  0x37   :  { %254 = dma.done.wait [#allocation4], 2688  }
  0x38   :  { %255 = vsyncadd [#allocation4], 4294964608 }
  0x39   :  { %182 = vsyncpa [#allocation3], 1 }
  0x3a   :  { %183 = vsyncpa [#allocation6], 1 }
  0x3b   :  { %184 = vsyncpa [#allocation4], 1 }

</bundles_post_ra>
